<compile_context>
chip_gen: v5e
topology: v5e:2x2
jax: 0.10.0
libtpu: 0.0.40
codegen_flags: <defaults>
</compile_context>

<pallas_src>
import functools

import jax
import jax.numpy as jnp
from jax.experimental import pallas as pl
from jax.experimental.pallas import tpu as pltpu

LN_EPS = 1e-5  # torch.nn.LayerNorm default


def _round_up(n, m):
    return ((n + m - 1) // m) * m


def _merge_ln_project_kernel(even_ref, odd_ref, we_ref, wo_ref, c1_ref, c2_ref, o_ref):
    """Fused LayerNorm + projection over 2x2-merged patch rows.

    even_ref: (TM, 2C) rows = [x0 | x2]   (h-even source rows)
    odd_ref : (TM, 2C) rows = [x1 | x3]   (h-odd  source rows)
    we_ref  : (2C, OUT_PAD) gamma-folded weight rows matching [x0 | x2]
    wo_ref  : (2C, OUT_PAD) gamma-folded weight rows matching [x1 | x3]
    c1_ref  : (1, OUT_PAD) = gamma @ W
    c2_ref  : (1, OUT_PAD) = beta  @ W
    o_ref   : (TM, OUT_PAD)
    """
    ev = even_ref[...].astype(jnp.float32)
    od = odd_ref[...].astype(jnp.float32)

    # LayerNorm statistics over the (virtual) 4C concat: sums are additive
    # over the two halves, so the concat never needs to exist.
    inv_n = 1.0 / (2 * ev.shape[-1])  # 1 / (4*dim)
    s = jnp.sum(ev, axis=-1, keepdims=True) + jnp.sum(od, axis=-1, keepdims=True)
    ss = (jnp.sum(ev * ev, axis=-1, keepdims=True)
          + jnp.sum(od * od, axis=-1, keepdims=True))
    mean = s * inv_n
    var = jnp.maximum(ss * inv_n - mean * mean, 0.0)
    inv_std = jax.lax.rsqrt(var + LN_EPS)

    # x_cat @ (gamma ⊙ W) == ev @ We + od @ Wo   (rows of W pre-permuted).
    mm_dtype = we_ref.dtype  # bf16 on the v6e/v7x fast path, f32 otherwise
    acc = jnp.dot(ev.astype(mm_dtype), we_ref[...],
                  preferred_element_type=jnp.float32)
    acc = acc + jnp.dot(od.astype(mm_dtype), wo_ref[...],
                        preferred_element_type=jnp.float32)

    out = inv_std * (acc - mean * c1_ref[...]) + c2_ref[...]
    o_ref[...] = out.astype(o_ref.dtype)


@functools.partial(jax.jit, static_argnames=("tile_rows", "matmul_dtype"))
def patch_merging_2d(x, gamma, beta, w_reduction, *, tile_rows=512, matmul_dtype=None):
    """x: (..., H, W, dim) -> (..., ceil(H/2), ceil(W/2), out_dim).

    gamma, beta : LayerNorm(4*dim) affine parameters, shape (4*dim,)
    w_reduction : (4*dim, out_dim) — transpose of nn.Linear(4*dim, out_dim).weight
    """
    *lead, H, W, C = x.shape
    two_c = 2 * C
    out_dim = w_reduction.shape[1]

    if matmul_dtype is None:
        matmul_dtype = jnp.bfloat16 if x.dtype == jnp.bfloat16 else jnp.float32

    # Pad H/W to even if needed (matches F.pad in the PyTorch module).
    pad_h, pad_w = H % 2, W % 2
    if pad_h or pad_w:
        cfg = [(0, 0)] * (x.ndim - 3) + [(0, pad_h), (0, pad_w), (0, 0)]
        x = jnp.pad(x, cfg)
        H, W = H + pad_h, W + pad_w
    Hh, Wh = H // 2, W // 2

    # 2x2 gather as two 2-D row streams; no 4C concat is ever written to HBM.
    #   even rows (dh=0): columns [0:C]=x0, [C:2C]=x2
    #   odd  rows (dh=1): columns [0:C]=x1, [C:2C]=x3
    ev = x[..., 0::2, :, :].reshape(-1, two_c)
    od = x[..., 1::2, :, :].reshape(-1, two_c)
    n_rows = ev.shape[0]

    # Fold the LayerNorm affine into the reduction weight (host side, tiny).
    w32 = w_reduction.astype(jnp.float32)
    w_aff = gamma.astype(jnp.float32)[:, None] * w32           # (4C, out)
    c1 = jnp.sum(w_aff, axis=0, keepdims=True)                  # (1, out) = gamma @ W
    c2 = beta.astype(jnp.float32)[None, :] @ w32                # (1, out) = beta  @ W
    # Re-order the folded weight rows to match the [x0|x2] / [x1|x3] halves.
    we = jnp.concatenate([w_aff[0:C], w_aff[2 * C:3 * C]], axis=0)   # (2C, out)
    wo = jnp.concatenate([w_aff[C:2 * C], w_aff[3 * C:4 * C]], axis=0)

    # Lane-dense output: pad out_dim to a multiple of 128 (unmasked stores),
    # slice the zero columns off afterwards.
    out_pad = _round_up(out_dim, 128)
    if out_pad != out_dim:
        cpad = ((0, 0), (0, out_pad - out_dim))
        we = jnp.pad(we, cpad)
        wo = jnp.pad(wo, cpad)
        c1 = jnp.pad(c1, cpad)
        c2 = jnp.pad(c2, cpad)
    we = we.astype(matmul_dtype)
    wo = wo.astype(matmul_dtype)

    # Row tile: large to amortize per-step overhead and fill the MXU M dim;
    # multiple of 16 so bf16 sublane packing stays aligned.
    tm = min(_round_up(tile_rows, 16), _round_up(n_rows, 16))
    grid = (pl.cdiv(n_rows, tm),)  # ragged tail rows are masked on write

    out2d = pl.pallas_call(
        _merge_ln_project_kernel,
        out_shape=jax.ShapeDtypeStruct((n_rows, out_pad), x.dtype),
        grid_spec=pltpu.PrefetchScalarGridSpec(
            num_scalar_prefetch=0,
            grid=grid,
            in_specs=[
                pl.BlockSpec((tm, two_c), lambda i: (i, 0)),
                pl.BlockSpec((tm, two_c), lambda i: (i, 0)),
                pl.BlockSpec((two_c, out_pad), lambda i: (0, 0)),
                pl.BlockSpec((two_c, out_pad), lambda i: (0, 0)),
                pl.BlockSpec((1, out_pad), lambda i: (0, 0)),
                pl.BlockSpec((1, out_pad), lambda i: (0, 0)),
            ],
            out_specs=pl.BlockSpec((tm, out_pad), lambda i: (i, 0)),
        ),
        compiler_params=pltpu.CompilerParams(
            dimension_semantics=("parallel",),
            vmem_limit_bytes=48 * 1024 * 1024,
        ),
    )(ev, od, we, wo, c1, c2)

    out = out2d[:, :out_dim] if out_pad != out_dim else out2d
    return out.reshape(*lead, Hh, Wh, out_dim)


# ------------------------- pure-JAX reference ------------------------------
def _patch_merging_pad_ref(x):
    H, W = x.shape[-3], x.shape[-2]
    pad_h, pad_w = H % 2, W % 2
    if pad_h or pad_w:
        cfg = [(0, 0)] * (x.ndim - 3) + [(0, pad_h), (0, pad_w), (0, 0)]
        x = jnp.pad(x, cfg)
    x0 = x[..., 0::2, 0::2, :]
    x1 = x[..., 1::2, 0::2, :]
    x2 = x[..., 0::2, 1::2, :]
    x3 = x[..., 1::2, 1::2, :]
    return jnp.concatenate([x0, x1, x2, x3], axis=-1)


def reference_patch_merging(x, gamma, beta, w_reduction):
    xm = _patch_merging_pad_ref(x).astype(jnp.float32)
    mean = jnp.mean(xm, axis=-1, keepdims=True)
    var = jnp.mean((xm - mean) ** 2, axis=-1, keepdims=True)
    xn = (xm - mean) / jnp.sqrt(var + LN_EPS)
    xn = xn * gamma.astype(jnp.float32) + beta.astype(jnp.float32)
    return xn @ w_reduction.astype(jnp.float32)


if __name__ == "__main__":
    key = jax.random.PRNGKey(0)
    B, H, W, dim = 2, 16, 16, 8
    out_dim = 2 * dim  # module default out_dim=-1 -> 2*dim

    kx, kw = jax.random.split(key)
    x = jax.random.normal(kx, (B, H, W, dim), dtype=jnp.float32)

    # nn.Linear(4*dim, 2*dim, bias=False): weight (2*dim, 4*dim); store its
    # transpose (4*dim, 2*dim) so the kernel computes x @ W.
    w_reduction = jax.random.normal(kw, (4 * dim, out_dim), dtype=jnp.float32) * (
        1.0 / jnp.sqrt(4.0 * dim))
    # nn.LayerNorm(4*dim) defaults: weight=1, bias=0.
    gamma = jnp.ones((4 * dim,), dtype=jnp.float32)
    beta = jnp.zeros((4 * dim,), dtype=jnp.float32)

    ref = reference_patch_merging(x, gamma, beta, w_reduction)

    # f32 path: exact check.
    out = jax.block_until_ready(patch_merging_2d(x, gamma, beta, w_reduction))
    assert out.shape == (B, H // 2, W // 2, out_dim), out.shape
    err = float(jnp.max(jnp.abs(out - ref)))
    assert err < 1e-4, err

    # bf16 MXU fast path (v6e/v7x): bf16 operands, f32 accumulation.
    out_bf16 = jax.block_until_ready(
        patch_merging_2d(x.astype(jnp.bfloat16), gamma, beta, w_reduction,
                         matmul_dtype=jnp.bfloat16))
    assert out_bf16.shape == (B, H // 2, W // 2, out_dim), out_bf16.shape
    assert out_bf16.dtype == jnp.bfloat16
    err_bf16 = float(jnp.max(jnp.abs(out_bf16.astype(jnp.float32) - ref)))
    assert err_bf16 < 0.25, err_bf16

    print("KERNEL_OK")
</pallas_src>

<mosaic_0001>
module attributes {stable_mosaic.version = 11 : i64} {
  func.func @_merge_ln_project_kernel(%arg0: i32, %arg1: memref<128x16xf32, #tpu.memory_space<vmem>>, %arg2: memref<128x16xf32, #tpu.memory_space<vmem>>, %arg3: memref<16x128xf32, #tpu.memory_space<vmem>>, %arg4: memref<16x128xf32, #tpu.memory_space<vmem>>, %arg5: memref<1x128xf32, #tpu.memory_space<vmem>>, %arg6: memref<1x128xf32, #tpu.memory_space<vmem>>, %arg7: memref<128x128xf32, #tpu.memory_space<vmem>>) attributes {dimension_semantics = [#tpu.dimension_semantics<parallel>], iteration_bounds = array<i64: 1>, scalar_prefetch = 0 : i64, scratch_operands = 0 : i64, tpu.core_type = #tpu.core_type<tc>, window_params = [{transform_indices = @transform_0, window_bounds = array<i64: 128, 16>}, {transform_indices = @transform_1, window_bounds = array<i64: 128, 16>}, {pipeline_mode = #tpu.pipeline_mode<synchronous>, transform_indices = @transform_2, window_bounds = array<i64: 16, 128>}, {pipeline_mode = #tpu.pipeline_mode<synchronous>, transform_indices = @transform_3, window_bounds = array<i64: 16, 128>}, {pipeline_mode = #tpu.pipeline_mode<synchronous>, transform_indices = @transform_4, window_bounds = array<i64: 1, 128>}, {pipeline_mode = #tpu.pipeline_mode<synchronous>, transform_indices = @transform_5, window_bounds = array<i64: 1, 128>}, {transform_indices = @transform_6, window_bounds = array<i64: 128, 128>}]} {
    %c0 = arith.constant 0 : index
    %c0_0 = arith.constant 0 : index
    %0 = vector.load %arg1[%c0, %c0_0] : memref<128x16xf32, #tpu.memory_space<vmem>>, vector<128x16xf32>
    %c0_1 = arith.constant 0 : index
    %c0_2 = arith.constant 0 : index
    %1 = vector.load %arg2[%c0_1, %c0_2] : memref<128x16xf32, #tpu.memory_space<vmem>>, vector<128x16xf32>
    %cst = arith.constant dense<0.000000e+00> : vector<128xf32>
    %2 = vector.multi_reduction <add>, %0, %cst [1] : vector<128x16xf32> to vector<128xf32>
    %3 = vector.shape_cast %2 : vector<128xf32> to vector<128x1xf32>
    %cst_3 = arith.constant dense<0.000000e+00> : vector<128xf32>
    %4 = vector.multi_reduction <add>, %1, %cst_3 [1] : vector<128x16xf32> to vector<128xf32>
    %5 = vector.shape_cast %4 : vector<128xf32> to vector<128x1xf32>
    %6 = arith.addf %3, %5 : vector<128x1xf32>
    %7 = arith.mulf %0, %0 : vector<128x16xf32>
    %cst_4 = arith.constant dense<0.000000e+00> : vector<128xf32>
    %8 = vector.multi_reduction <add>, %7, %cst_4 [1] : vector<128x16xf32> to vector<128xf32>
    %9 = vector.shape_cast %8 : vector<128xf32> to vector<128x1xf32>
    %10 = arith.mulf %1, %1 : vector<128x16xf32>
    %cst_5 = arith.constant dense<0.000000e+00> : vector<128xf32>
    %11 = vector.multi_reduction <add>, %10, %cst_5 [1] : vector<128x16xf32> to vector<128xf32>
    %12 = vector.shape_cast %11 : vector<128xf32> to vector<128x1xf32>
    %13 = arith.addf %9, %12 : vector<128x1xf32>
    %cst_6 = arith.constant 3.125000e-02 : f32
    %14 = vector.broadcast %cst_6 : f32 to vector<128x1xf32>
    %15 = arith.mulf %6, %14 : vector<128x1xf32>
    %cst_7 = arith.constant 3.125000e-02 : f32
    %16 = vector.broadcast %cst_7 : f32 to vector<128x1xf32>
    %17 = arith.mulf %13, %16 : vector<128x1xf32>
    %18 = arith.mulf %15, %15 : vector<128x1xf32>
    %19 = arith.subf %17, %18 : vector<128x1xf32>
    %cst_8 = arith.constant 0.000000e+00 : f32
    %20 = vector.broadcast %cst_8 : f32 to vector<128x1xf32>
    %21 = arith.maximumf %19, %20 : vector<128x1xf32>
    %cst_9 = arith.constant 9.99999974E-6 : f32
    %22 = vector.broadcast %cst_9 : f32 to vector<128x1xf32>
    %23 = arith.addf %21, %22 : vector<128x1xf32>
    %24 = math.rsqrt %23 : vector<128x1xf32>
    %c0_10 = arith.constant 0 : index
    %c0_11 = arith.constant 0 : index
    %25 = vector.load %arg3[%c0_10, %c0_11] : memref<16x128xf32, #tpu.memory_space<vmem>>, vector<16x128xf32>
    %cst_12 = arith.constant dense<0.000000e+00> : vector<128x128xf32>
    %26 = tpu.matmul %0, %25, %cst_12 {dimension_numbers = #tpu.dot_dimension_numbers<[1], [0], [0], [1], [0, 0, 1, 1], [], []>} : vector<128x16xf32>, vector<16x128xf32>, vector<128x128xf32> -> vector<128x128xf32>
    %c0_13 = arith.constant 0 : index
    %c0_14 = arith.constant 0 : index
    %27 = vector.load %arg4[%c0_13, %c0_14] : memref<16x128xf32, #tpu.memory_space<vmem>>, vector<16x128xf32>
    %cst_15 = arith.constant dense<0.000000e+00> : vector<128x128xf32>
    %28 = tpu.matmul %1, %27, %cst_15 {dimension_numbers = #tpu.dot_dimension_numbers<[1], [0], [0], [1], [0, 0, 1, 1], [], []>} : vector<128x16xf32>, vector<16x128xf32>, vector<128x128xf32> -> vector<128x128xf32>
    %29 = arith.addf %26, %28 : vector<128x128xf32>
    %c0_16 = arith.constant 0 : index
    %c0_17 = arith.constant 0 : index
    %30 = vector.load %arg5[%c0_16, %c0_17] : memref<1x128xf32, #tpu.memory_space<vmem>>, vector<1x128xf32>
    %31 = vector.broadcast %15 : vector<128x1xf32> to vector<128x128xf32>
    %32 = vector.broadcast %30 : vector<1x128xf32> to vector<128x128xf32>
    %33 = arith.mulf %31, %32 : vector<128x128xf32>
    %34 = arith.subf %29, %33 : vector<128x128xf32>
    %35 = vector.broadcast %24 : vector<128x1xf32> to vector<128x128xf32>
    %36 = arith.mulf %35, %34 : vector<128x128xf32>
    %c0_18 = arith.constant 0 : index
    %c0_19 = arith.constant 0 : index
    %37 = vector.load %arg6[%c0_18, %c0_19] : memref<1x128xf32, #tpu.memory_space<vmem>>, vector<1x128xf32>
    %38 = vector.broadcast %37 : vector<1x128xf32> to vector<128x128xf32>
    %39 = arith.addf %36, %38 : vector<128x128xf32>
    %c0_20 = arith.constant 0 : index
    %c0_21 = arith.constant 0 : index
    %40 = vector.load %arg7[%c0_20, %c0_21] : memref<128x128xf32, #tpu.memory_space<vmem>>, vector<128x128xf32>
    tpu.vector_store %arg7[%c0_20, %c0_21], %39 {strides = array<i32>} : memref<128x128xf32, #tpu.memory_space<vmem>>, vector<128x128xf32>,
    return
  }
  func.func @transform_0(%arg0: i32) -> (i32, i32) {
    %c0_i32 = arith.constant 0 : i32
    %c0_i32_0 = arith.constant 0 : i32
    return %arg0, %c0_i32 : i32, i32
  }
  func.func @transform_1(%arg0: i32) -> (i32, i32) {
    %c0_i32 = arith.constant 0 : i32
    %c0_i32_0 = arith.constant 0 : i32
    return %arg0, %c0_i32 : i32, i32
  }
  func.func @transform_2(%arg0: i32) -> (i32, i32) {
    %c0_i32 = arith.constant 0 : i32
    %c0_i32_0 = arith.constant 0 : i32
    %c0_i32_1 = arith.constant 0 : i32
    return %c0_i32, %c0_i32_0 : i32, i32
  }
  func.func @transform_3(%arg0: i32) -> (i32, i32) {
    %c0_i32 = arith.constant 0 : i32
    %c0_i32_0 = arith.constant 0 : i32
    %c0_i32_1 = arith.constant 0 : i32
    return %c0_i32, %c0_i32_0 : i32, i32
  }
  func.func @transform_4(%arg0: i32) -> (i32, i32) {
    %c0_i32 = arith.constant 0 : i32
    %c0_i32_0 = arith.constant 0 : i32
    %c0_i32_1 = arith.constant 0 : i32
    return %c0_i32, %c0_i32_0 : i32, i32
  }
  func.func @transform_5(%arg0: i32) -> (i32, i32) {
    %c0_i32 = arith.constant 0 : i32
    %c0_i32_0 = arith.constant 0 : i32
    %c0_i32_1 = arith.constant 0 : i32
    return %c0_i32, %c0_i32_0 : i32, i32
  }
  func.func @transform_6(%arg0: i32) -> (i32, i32) {
    %c0_i32 = arith.constant 0 : i32
    %c0_i32_0 = arith.constant 0 : i32
    return %arg0, %c0_i32 : i32, i32
  }
}

</mosaic_0001>

<bundles_post_ra>
// kernel: patch_merging_2d.1
= control target key start
LH: loop header
LB: loop body
LE: loop exit
PB: predicated region body
PF: predicated region fallthrough
CT: control target
= control target key end

     0   :  { %vm56_vm0 = vcmask 130048   ;;  %s1940_s0 = inlined_call_operand.vmem [shape: f32[128,16], index: 0, kind: input, shape index: {}]   ;;  %s1941_s1 = inlined_call_operand.vmem [shape: f32[128,16], index: 1, kind: input, shape index: {}]   ;;  %s1942_s2 = inlined_call_operand.vmem [shape: f32[16,128], index: 2, kind: input, shape index: {}]   ;;  %s1943_s3 = inlined_call_operand.vmem [shape: f32[16,128], index: 3, kind: input, shape index: {}]   ;;  %s1944_s4 = inlined_call_operand.vmem [shape: f32[1,128], index: 4, kind: input, shape index: {}]   ;;  %s1945_s5 = inlined_call_operand.vmem [shape: f32[1,128], index: 5, kind: input, shape index: {}]   ;;  %s1946_s6 = inlined_call_operand.hbm [shape: f32[128,128], index: 6, kind: output, shape index: {}]  }
   0x1   :  { %v572_v0 = vld [vmem:[%s1943_s3 + $0x8] sm:$0xff]  ;;  %v1051_v2 = vld [vmem:[%s1940_s0 + $0x20] sm:$0xff]  ;;  %v1058_v4 = vld [vmem:[%s1940_s0 + $0x10] sm:$0xff] }
   0x2   :  { %v570_v1 = vld [vmem:[%s1942_s2 + $0x8] sm:$0xff]  ;;  %635 = vmatpush.msra.mxu0 %v572_v0  ;;  %v69_v3 = vsel %vm56_vm0, %v1051_v2, 0.0  ;;  %v1063_v5 = vld [vmem:[%s1940_s0] sm:$0xff]  ;;  %v63_v7 = vsel %vm56_vm0, %v1058_v4, 0.0  ;;  %937 = vmatpush.msra.mxu2 %v572_v0  ;;  %v1097_v13 = vld [vmem:[%s1940_s0 + $0x18] sm:$0xff] }
   0x3   :  { %748 = vmatpush.msra.mxu1 %v570_v1  ;;  %v571_v6 = vld [vmem:[%s1943_s3] sm:$0xff]  ;;  %70 = vadd.xlane.f32.xlu2 %v69_v3  ;;  %v57_v8 = vsel %vm56_vm0, %v1063_v5, 0.0  ;;  %v1083_v11 = vld [vmem:[%s1940_s0 + $0x28] sm:$0xff]  ;;  %v66_v17 = vsel %vm56_vm0, %v1097_v13, 0.0 }
   0x4   :  { %v569_v9 = vld [vmem:[%s1942_s2] sm:$0xff]  ;;  %64 = vadd.xlane.f32.xlu1 %v63_v7  ;;  %58 = vadd.xlane.f32.xlu0 %v57_v8  ;;  %v1102_v14 = vld [vmem:[%s1940_s0 + $0x8] sm:$0xff]  ;;  %v72_v16 = vsel %vm56_vm0, %v1083_v11, 0.0 }
   0x5   :  { %v1078_v10 = vld [vmem:[%s1941_s1] sm:$0xff]  ;;  %636 = vmatpush.msra.mxu0 %v571_v6  ;;  %749 = vmatpush.msra.mxu1 %v569_v9  ;;  %v60_v18 = vsel %vm56_vm0, %v1102_v14, 0.0  ;;  %v1122_v19 = vld [vmem:[%s1941_s1 + $0x8] sm:$0xff] }
   0x6   :  { %v1088_v12 = vld [vmem:[%s1941_s1 + $0x40] sm:$0xff]  ;;  %905 = vmatmul.msk.f32.vlgmr.msra.gmra.mxu0 %vm56_vm0, %v1078_v10  ;;  %921 = vmatmul.msk.f32.vlgmr.msra.gmra.mxu1 %vm56_vm0, %v1063_v5 }
   0x7   :  { %939 = vmatpush.msra.mxu3 %v570_v1  ;;  %938 = vmatpush.msra.mxu2 %v571_v6  ;;  %v1107_v15 = vld [vmem:[%s1940_s0 + $0x40] sm:$0xff] }
   0x8   :  { %913 = vmatmul.msk.f32.vlgmr.msra.gmra.mxu2 %vm56_vm0, %v1088_v12 }
   0x9   :  { %940 = vmatpush.msra.mxu3 %v569_v9 }
   0xa   :  { %929 = vmatmul.msk.f32.vlgmr.msra.gmra.mxu3 %vm56_vm0, %v1107_v15 }
   0xb   :  { %73 = vadd.xlane.f32.xlu2 %v72_v16 }
   0xc   :  { %11 = vsyncpa [#allocation3], 0  ;;  %67 = vadd.xlane.f32.xlu1 %v66_v17  ;;  %61 = vadd.xlane.f32.xlu0 %v60_v18  ;;  %v1127_v20 = vld [vmem:[%s1941_s1 + $0x48] sm:$0xff]  ;;  %v1136_v21 = vld [vmem:[%s1940_s0 + $0x38] sm:$0xff]  ;;  %v81_v24 = vsel %vm56_vm0, %v1107_v15, 0.0  ;;  %v108_v45 = vsel %vm56_vm0, %v1122_v19, 0.0  ;;  %v169_v3 = vmul.f32 %v1063_v5, %v1063_v5  ;;  %v172_v9 = vmul.f32 %v1097_v13, %v1097_v13 }
   0xd   :  { %v1141_v22 = vld [vmem:[%s1940_s0 + $0x30] sm:$0xff]  ;;  %v1146_v23 = vld [vmem:[%s1940_s0 + $0x48] sm:$0xff]  ;;  %v78_v25 = vsel %vm56_vm0, %v1136_v21, 0.0  ;;  %v1166_v28 = vld [vmem:[%s1940_s0 + $0x58] sm:$0xff]  ;;  %v105_v46 = vsel %vm56_vm0, %v1078_v10, 0.0  ;;  %v132_v61 = vsel %vm56_vm0, %v1127_v20, 0.0  ;;  %v171_v16 = vmul.f32 %v1058_v4, %v1058_v4 }
   0xe   :  { %906 = vmatmul.msk.f32.gmra.mxu0 %vm56_vm0, %v1122_v19  ;;  %922 = vmatmul.msk.f32.gmra.mxu1 %vm56_vm0, %v1102_v14  ;;  %v75_v26 = vsel %vm56_vm0, %v1141_v22, 0.0  ;;  %v1161_v27 = vld [vmem:[%s1941_s1 + $0x10] sm:$0xff]  ;;  %v90_v31 = vsel %vm56_vm0, %v1166_v28, 0.0  ;;  %v84_v33 = vsel %vm56_vm0, %v1146_v23, 0.0  ;;  %v1195_v34 = vld [vmem:[%s1941_s1 + $0x18] sm:$0xff]  ;;  %v1214_v37 = vld [vmem:[%s1940_s0 + $0x68] sm:$0xff]  ;;  %v170_v5 = vmul.f32 %v1102_v14, %v1102_v14 }
   0xf   :  { %v1171_v29 = vld [vmem:[%s1941_s1 + $0x50] sm:$0xff]  ;;  %v1205_v36 = vld [vmem:[%s1941_s1 + $0x58] sm:$0xff]  ;;  %v1219_v38 = vld [vmem:[%s1940_s0 + $0x60] sm:$0xff]  ;;  %v96_v40 = vsel %vm56_vm0, %v1214_v37, 0.0  ;;  %v114_v51 = vsel %vm56_vm0, %v1195_v34, 0.0  ;;  %v111_v52 = vsel %vm56_vm0, %v1161_v27, 0.0 }
  0x10   :  { %914 = vmatmul.msk.f32.gmra.mxu2 %vm56_vm0, %v1127_v20  ;;  %v1180_v30 = vld [vmem:[%s1940_s0 + $0x50] sm:$0xff]  ;;  %v93_v41 = vsel %vm56_vm0, %v1219_v38, 0.0  ;;  %v1234_v42 = vld [vmem:[%s1941_s1 + $0x20] sm:$0xff]  ;;  %v1248_v44 = vld [vmem:[%s1940_s0 + $0x78] sm:$0xff]  ;;  %v135_v60 = vsel %vm56_vm0, %v1171_v29, 0.0  ;;  %v129_v62 = vsel %vm56_vm0, %v1088_v12, 0.0 }
  0x11   :  { %v87_v32 = vsel %vm56_vm0, %v1180_v30, 0.0  ;;  %v1200_v35 = vld [vmem:[%s1940_s0 + $0x70] sm:$0xff]  ;;  %v1239_v43 = vld [vmem:[%s1941_s1 + $0x60] sm:$0xff]  ;;  %v102_v47 = vsel %vm56_vm0, %v1248_v44, 0.0  ;;  %v1263_v48 = vld [vmem:[%s1941_s1 + $0x28] sm:$0xff]  ;;  %v117_v50 = vsel %vm56_vm0, %v1234_v42, 0.0 }
  0x12   :  { %930 = vmatmul.msk.f32.gmra.mxu3 %vm56_vm0, %v1146_v23  ;;  %v99_v39 = vsel %vm56_vm0, %v1200_v35, 0.0  ;;  %v1268_v49 = vld [vmem:[%s1941_s1 + $0x68] sm:$0xff]  ;;  %v1287_v53 = vld [vmem:[%s1941_s1 + $0x30] sm:$0xff]  ;;  %v1292_v54 = vld [vmem:[%s1941_s1 + $0x38] sm:$0xff]  ;;  %v120_v58 = vsel %vm56_vm0, %v1263_v48, 0.0  ;;  %v141_v0 = vsel %vm56_vm0, %v1239_v43, 0.0 }
  0x13   :  { %82 = vadd.xlane.f32.xlu2 %v81_v24  ;;  %v1297_v55 = vld [vmem:[%s1941_s1 + $0x70] sm:$0xff]  ;;  %v126_v56 = vsel %vm56_vm0, %v1292_v54, 0.0  ;;  %v123_v57 = vsel %vm56_vm0, %v1287_v53, 0.0  ;;  %v1316_v59 = vld [vmem:[%s1941_s1 + $0x78] sm:$0xff]  ;;  %v144_v63 = vsel %vm56_vm0, %v1268_v49, 0.0  ;;  %v138_v1 = vsel %vm56_vm0, %v1205_v36, 0.0 }
  0x14   :  { %79 = vadd.xlane.f32.xlu1 %v78_v25  ;;  %76 = vadd.xlane.f32.xlu0 %v75_v26  ;;  %v185_v6 = vsel %vm56_vm0, %v169_v3, 0.0  ;;  %v150_v7 = vsel %vm56_vm0, %v1316_v59, 0.0  ;;  %v147_v8 = vsel %vm56_vm0, %v1297_v55, 0.0  ;;  %v194_v17 = vsel %vm56_vm0, %v172_v9, 0.0  ;;  %s893_s19 = sshll.u32 %s1946_s6, 4  ;;  %s1005_s20 = smov 128   ;;  %s894_s19 = int_to_ptr.hbm [resolvable:$true] %s893_s19 }
  0x15   :  { %v191_v18 = vsel %vm56_vm0, %v171_v16, 0.0  ;;  %v188_v24 = vsel %vm56_vm0, %v170_v5, 0.0  ;;  %v175_v25 = vmul.f32 %v1141_v22, %v1141_v22  ;;  %s1006_s21 = smov 8  }
  0x16   :  { %907 = vmatmul.msk.f32.gmra.mxu0 %vm56_vm0, %v1161_v27  ;;  %923 = vmatmul.msk.f32.gmra.mxu1 %vm56_vm0, %v1058_v4  ;;  %v173_v4 = vmul.f32 %v1051_v2, %v1051_v2 }
  0x17   :  { %v203_v14 = vsel %vm56_vm0, %v175_v25, 0.0 }
  0x18   :  { %915 = vmatmul.msk.f32.gmra.mxu2 %vm56_vm0, %v1171_v29 }
  0x1a   :  { %931 = vmatmul.msk.f32.gmra.mxu3 %vm56_vm0, %v1180_v30 }
  0x1b   :  { %91 = vadd.xlane.f32.xlu2 %v90_v31  ;;  %v197_v31 = vsel %vm56_vm0, %v173_v4, 0.0 }
  0x1c   :  { %88 = vadd.xlane.f32.xlu1 %v87_v32  ;;  %85 = vadd.xlane.f32.xlu0 %v84_v33  ;;  %v178_v32 = vmul.f32 %v1146_v23, %v1146_v23  ;;  %v180_v23 = vmul.f32 %v1166_v28, %v1166_v28 }
  0x1e   :  { %908 = vmatmul.msk.f32.gmra.mxu0 %vm56_vm0, %v1195_v34  ;;  %924 = vmatmul.msk.f32.gmra.mxu1 %vm56_vm0, %v1097_v13  ;;  %v174_v13 = vmul.f32 %v1083_v11, %v1083_v11 }
  0x20   :  { %916 = vmatmul.msk.f32.gmra.mxu2 %vm56_vm0, %v1205_v36  ;;  %v200_v26 = vsel %vm56_vm0, %v174_v13, 0.0 }
  0x22   :  { %932 = vmatmul.msk.f32.gmra.mxu3 %vm56_vm0, %v1166_v28  ;;  %v182_v28 = vmul.f32 %v1214_v37, %v1214_v37 }
  0x23   :  { %100 = vadd.xlane.f32.xlu2 %v99_v39 }
  0x24   :  { %97 = vadd.xlane.f32.xlu1 %v96_v40  ;;  %94 = vadd.xlane.f32.xlu0 %v93_v41  ;;  %v181_v40 = vmul.f32 %v1219_v38, %v1219_v38  ;;  %v218_v41 = vsel %vm56_vm0, %v180_v23, 0.0 }
  0x26   :  { %909 = vmatmul.msk.f32.gmra.mxu0 %vm56_vm0, %v1234_v42  ;;  %925 = vmatmul.msk.f32.gmra.mxu1 %vm56_vm0, %v1051_v2  ;;  %v212_v2 = vsel %vm56_vm0, %v178_v32, 0.0 }
  0x28   :  { %917 = vmatmul.msk.f32.gmra.mxu2 %vm56_vm0, %v1239_v43 }
  0x2a   :  { %933 = vmatmul.msk.f32.gmra.mxu3 %vm56_vm0, %v1219_v38  ;;  %v183_v38 = vmul.f32 %v1200_v35, %v1200_v35 }
  0x2b   :  { %109 = vadd.xlane.f32.xlu2 %v108_v45 }
  0x2c   :  { %106 = vadd.xlane.f32.xlu1 %v105_v46  ;;  %103 = vadd.xlane.f32.xlu0 %v102_v47  ;;  %v184_v46 = vmul.f32 %v1248_v44, %v1248_v44 }
  0x2e   :  { %910 = vmatmul.msk.f32.gmra.mxu0 %vm56_vm0, %v1263_v48  ;;  %926 = vmatmul.msk.f32.gmra.mxu1 %vm56_vm0, %v1083_v11  ;;  %v176_v11 = vmul.f32 %v1136_v21, %v1136_v21 }
  0x30   :  { %918 = vmatmul.msk.f32.gmra.mxu2 %vm56_vm0, %v1268_v49  ;;  %v206_v39 = vsel %vm56_vm0, %v176_v11, 0.0 }
  0x32   :  { %934 = vmatmul.msk.f32.gmra.mxu3 %vm56_vm0, %v1214_v37  ;;  %v234_v37 = vmul.f32 %v1122_v19, %v1122_v19  ;;  %v238_v19 = vmul.f32 %v1263_v48, %v1263_v48  ;;  %v241_v48 = vmul.f32 %v1088_v12, %v1088_v12  ;;  %v244_v12 = vmul.f32 %v1205_v36, %v1205_v36 }
  0x33   :  { %118 = vadd.xlane.f32.xlu2 %v117_v50  ;;  %v247_v36 = vmul.f32 %v1297_v55, %v1297_v55 }
  0x34   :  { %115 = vadd.xlane.f32.xlu1 %v114_v51  ;;  %112 = vadd.xlane.f32.xlu0 %v111_v52  ;;  %v230_v51 = vsel %vm56_vm0, %v184_v46, 0.0  ;;  %v227_v52 = vsel %vm56_vm0, %v183_v38, 0.0 }
  0x36   :  { %911 = vmatmul.msk.f32.gmra.mxu0 %vm56_vm0, %v1287_v53  ;;  %927 = vmatmul.msk.f32.gmra.mxu1 %vm56_vm0, %v1141_v22  ;;  %v177_v22 = vmul.f32 %v1107_v15, %v1107_v15  ;;  %v179_v15 = vmul.f32 %v1180_v30, %v1180_v30 }
  0x38   :  { %919 = vmatmul.msk.f32.gmra.mxu2 %vm56_vm0, %v1297_v55  ;;  %v209_v33 = vsel %vm56_vm0, %v177_v22, 0.0  ;;  %v215_v45 = vsel %vm56_vm0, %v179_v15, 0.0 }
  0x3a   :  { %935 = vmatmul.msk.f32.gmra.mxu3 %vm56_vm0, %v1200_v35  ;;  %v235_v35 = vmul.f32 %v1161_v27, %v1161_v27  ;;  %v236_v27 = vmul.f32 %v1195_v34, %v1195_v34  ;;  %v239_v34 = vmul.f32 %v1287_v53, %v1287_v53  ;;  %v242_v53 = vmul.f32 %v1127_v20, %v1127_v20 }
  0x3b   :  { %127 = vadd.xlane.f32.xlu2 %v126_v56  ;;  %v224_v56 = vsel %vm56_vm0, %v182_v28, 0.0  ;;  %v245_v20 = vmul.f32 %v1239_v43, %v1239_v43 }
  0x3c   :  { %124 = vadd.xlane.f32.xlu1 %v123_v57  ;;  %121 = vadd.xlane.f32.xlu0 %v120_v58 }
  0x3d   :  { %v285_v23 = vsel %vm56_vm0, %v245_v20, 0.0 }
  0x3e   :  { %912 = vmatmul.msk.f32.gmra.mxu0 %vm56_vm0, %v1292_v54  ;;  %928 = vmatmul.msk.f32.gmra.mxu1 %vm56_vm0, %v1136_v21  ;;  %v221_v21 = vsel %vm56_vm0, %v181_v40, 0.0 }
  0x40   :  { %920 = vmatmul.msk.f32.gmra.mxu2 %vm56_vm0, %v1316_v59 }
  0x42   :  { %936 = vmatmul.msk.f32.gmra.mxu3 %vm56_vm0, %v1248_v44  ;;  %v233_v44 = vmul.f32 %v1078_v10, %v1078_v10  ;;  %v237_v10 = vmul.f32 %v1234_v42, %v1234_v42  ;;  %v240_v42 = vmul.f32 %v1292_v54, %v1292_v54  ;;  %v243_v54 = vmul.f32 %v1171_v29, %v1171_v29 }
  0x43   :  { %136 = vadd.xlane.f32.xlu2 %v135_v60  ;;  %v246_v29 = vmul.f32 %v1268_v49, %v1268_v49  ;;  %v248_v49 = vmul.f32 %v1316_v59, %v1316_v59 }
  0x44   :  { %133 = vadd.xlane.f32.xlu1 %v132_v61  ;;  %130 = vadd.xlane.f32.xlu0 %v129_v62  ;;  %v255_v61 = vsel %vm56_vm0, %v235_v35, 0.0  ;;  %v252_v62 = vsel %vm56_vm0, %v234_v37, 0.0 }
  0x45   :  { %v288_v40 = vsel %vm56_vm0, %v246_v29, 0.0  ;;  %v294_v46 = vsel %vm56_vm0, %v248_v49, 0.0 }
  0x4b   :  { %145 = vadd.xlane.f32.xlu2 %v144_v63  ;;  %v249_v63 = vsel %vm56_vm0, %v233_v44, 0.0 }
  0x4c   :  { %142 = vadd.xlane.f32.xlu1 %v141_v0  ;;  %139 = vadd.xlane.f32.xlu0 %v138_v1 }
  0x53   :  { %186 = vadd.xlane.f32.xlu2 %v185_v6  ;;  %v264_v6 = vsel %vm56_vm0, %v238_v19, 0.0 }
  0x54   :  { %151 = vadd.xlane.f32.xlu1 %v150_v7  ;;  %148 = vadd.xlane.f32.xlu0 %v147_v8  ;;  %v261_v7 = vsel %vm56_vm0, %v237_v10, 0.0  ;;  %v258_v8 = vsel %vm56_vm0, %v236_v27, 0.0 }
  0x5b   :  { %195 = vadd.xlane.f32.xlu2 %v194_v17  ;;  %v273_v17 = vsel %vm56_vm0, %v241_v48, 0.0 }
  0x5c   :  { %192 = vadd.xlane.f32.xlu1 %v191_v18  ;;  %189 = vadd.xlane.f32.xlu0 %v188_v24  ;;  %v270_v18 = vsel %vm56_vm0, %v240_v42, 0.0  ;;  %v267_v24 = vsel %vm56_vm0, %v239_v34, 0.0 }
  0x63   :  { %204 = vadd.xlane.f32.xlu2 %v203_v14  ;;  %v282_v14 = vsel %vm56_vm0, %v244_v12, 0.0 }
  0x64   :  { %201 = vadd.xlane.f32.xlu1 %v200_v26  ;;  %198 = vadd.xlane.f32.xlu0 %v197_v31  ;;  %v279_v26 = vsel %vm56_vm0, %v243_v54, 0.0  ;;  %v276_v31 = vsel %vm56_vm0, %v242_v53, 0.0 }
  0x6b   :  { %213 = vadd.xlane.f32.xlu2 %v212_v2 }
  0x6c   :  { %210 = vadd.xlane.f32.xlu1 %v209_v33  ;;  %207 = vadd.xlane.f32.xlu0 %v206_v39  ;;  %v291_v39 = vsel %vm56_vm0, %v247_v36, 0.0 }
  0x73   :  { %222 = vadd.xlane.f32.xlu2 %v221_v21 }
  0x74   :  { %219 = vadd.xlane.f32.xlu1 %v218_v41  ;;  %216 = vadd.xlane.f32.xlu0 %v215_v45 }
  0x76   :  { %v1387_v47 = vpop.xlane.xlu2 %70 }
  0x77   :  { %v1389_v30 = vpop.xlane.xlu1 %64  ;;  %v59_v50 = vpop.xlane.xlu0 %58 }
  0x7b   :  { %231 = vadd.xlane.f32.xlu2 %v230_v51 }
  0x7c   :  { %228 = vadd.xlane.f32.xlu1 %v227_v52  ;;  %225 = vadd.xlane.f32.xlu0 %v224_v56 }
  0x7e   :  { %v1400_v57 = vpop.xlane.xlu2 %73 }
  0x7f   :  { %v1402_v58 = vpop.xlane.xlu1 %67  ;;  %v62_v60 = vpop.xlane.xlu0 %61 }
  0x83   :  { %256 = vadd.xlane.f32.xlu2 %v255_v61  ;;  %v638_v52 = vpop.f32.mrf.mxu0  ;;  %v751_v44 = vpop.f32.mrf.mxu1 }
  0x84   :  { %253 = vadd.xlane.f32.xlu1 %v252_v62  ;;  %250 = vadd.xlane.f32.xlu0 %v249_v63 }
  0x86   :  { %v1413_v0 = vpop.xlane.xlu2 %82 }
  0x87   :  { %v80_v1 = vpop.xlane.xlu1 %79  ;;  %v77_v3 = vpop.xlane.xlu0 %76 }
  0x8b   :  { %265 = vadd.xlane.f32.xlu2 %v264_v6  ;;  %v641_v10 = vpop.f32.mrf.mxu0 }
  0x8c   :  { %262 = vadd.xlane.f32.xlu1 %v261_v7  ;;  %259 = vadd.xlane.f32.xlu0 %v258_v8 }
  0x8e   :  { %v1424_v9 = vpop.xlane.xlu2 %91 }
  0x8f   :  { %v89_v16 = vpop.xlane.xlu1 %88  ;;  %v86_v5 = vpop.xlane.xlu0 %85 }
  0x93   :  { %274 = vadd.xlane.f32.xlu2 %v273_v17  ;;  %v644_v48 = vpop.f32.mrf.mxu0 }
  0x94   :  { %271 = vadd.xlane.f32.xlu1 %v270_v18  ;;  %268 = vadd.xlane.f32.xlu0 %v267_v24  ;;  %v662_v18 = vpop.f32.mrf.mxu2  ;;  %v775_v24 = vpop.f32.mrf.mxu3 }
  0x96   :  { %v101_v25 = vpop.xlane.xlu2 %100 }
  0x97   :  { %v98_v13 = vpop.xlane.xlu1 %97  ;;  %v95_v4 = vpop.xlane.xlu0 %94 }
  0x9b   :  { %283 = vadd.xlane.f32.xlu2 %v282_v14  ;;  %v647_v17 = vpop.f32.mrf.mxu0 }
  0x9c   :  { %280 = vadd.xlane.f32.xlu1 %v279_v26  ;;  %277 = vadd.xlane.f32.xlu0 %v276_v31  ;;  %v1504_v31 = vpop.f32.mrf.mxu2  ;;  %v1506_v36 = vpop.f32.mrf.mxu3 }
  0x9d   :  { %1954 = vst [vmem:[#allocation5_spill] sm:$0xff] %v1506_v36 }
  0x9e   :  { %v110_v32 = vpop.xlane.xlu2 %109 }
  0x9f   :  { %v1444_v22 = vadd.f32 %v110_v32, %v62_v60  ;;  %v107_v11 = vpop.xlane.xlu1 %106  ;;  %v104_v2 = vpop.xlane.xlu0 %103 }
  0xa0   :  { %v1446_v33 = vadd.f32 %v107_v11, %v59_v50 }
  0xa1   :  { %v314_v49 = vmul.f32 0.03125, %v1444_v22 }
  0xa3   :  { %292 = vadd.xlane.f32.xlu2 %v291_v39 }
  0xa4   :  { %289 = vadd.xlane.f32.xlu1 %v288_v40  ;;  %286 = vadd.xlane.f32.xlu0 %v285_v23  ;;  %v668_v39 = vpop.f32.mrf.mxu2  ;;  %v781_v40 = vpop.f32.mrf.mxu3  ;;  %v1517_v23 = vld [vmem:[%s1944_s4] ss:$0 sm:$0xff] }
  0xa5   :  { %1955 = vst [vmem:[#allocation6_spill] sm:$0xff] %v1517_v23 }
  0xa6   :  { %v119_v43 = vpop.xlane.xlu2 %118 }
  0xa7   :  { %v1454_v55 = vadd.f32 %v119_v43, %v1387_v47  ;;  %v116_v15 = vpop.xlane.xlu1 %115  ;;  %v113_v21 = vpop.xlane.xlu0 %112  ;;  %v313_v43 = vmul.f32 0.03125, %v1446_v33 }
  0xa8   :  { %v1457_v41 = vadd.f32 %v116_v15, %v1402_v58  ;;  %v1460_v45 = vadd.f32 %v113_v21, %v1389_v30 }
  0xa9   :  { %v317_v22 = vmul.f32 0.03125, %v1454_v55 }
  0xaa   :  { %v316_v33 = vmul.f32 0.03125, %v1457_v41 }
  0xac   :  { %295 = vadd.xlane.f32.xlu0 %v294_v46 }
  0xae   :  { %v128_v38 = vpop.xlane.xlu2 %127 }
  0xaf   :  { %v1463_v28 = vadd.f32 %v128_v38, %v80_v1  ;;  %v125_v50 = vpop.xlane.xlu1 %124  ;;  %v122_v59 = vpop.xlane.xlu0 %121 }
  0xb0   :  { %v1465_v51 = vadd.f32 %v125_v50, %v77_v3  ;;  %v1468_v47 = vadd.f32 %v122_v59, %v1400_v57  ;;  %v754_v1 = vpop.f32.mrf.mxu1  ;;  %v1530_v50 = vmul.f32 %v1517_v23, %v314_v49  ;;  %v1532_v59 = vadd.f32 %v751_v44, %v638_v52 }
  0xb1   :  { %v1527_v38 = vadd.f32 %v754_v1, %v641_v10  ;;  %v346_v10 = vmul.f32 %v314_v49, %v314_v49  ;;  %v1546_v1 = vadd.f32 %v781_v40, %v668_v39  ;;  %v1569_v49 = vmul.f32 %v316_v33, %v316_v33 }
  0xb2   :  { %v319_v41 = vmul.f32 0.03125, %v1465_v51 }
  0xb3   :  { %1956 = vst [vmem:[#allocation7_spill] sm:$0xff] %v1546_v1 }
  0xb6   :  { %v137_v56 = vpop.xlane.xlu2 %136 }
  0xb7   :  { %v1470_v35 = vadd.f32 %v137_v56, %v89_v16  ;;  %v134_v37 = vpop.xlane.xlu1 %133  ;;  %v131_v30 = vpop.xlane.xlu0 %130  ;;  %v1535_v56 = vmul.f32 %v1517_v23, %v313_v43 }
  0xb8   :  { %v1472_v58 = vadd.f32 %v134_v37, %v86_v5  ;;  %v1475_v60 = vadd.f32 %v131_v30, %v1413_v0  ;;  %v757_v42 = vpop.f32.mrf.mxu1  ;;  %v1538_v37 = vadd.f32 %v775_v24, %v662_v18  ;;  %v315_v30 = vmul.f32 0.03125, %v1460_v45  ;;  %v784_v18 = vpop.f32.mrf.mxu3 }
  0xbe   :  { %v146_v61 = vpop.xlane.xlu2 %145 }
  0xbf   :  { %v1477_v62 = vadd.f32 %v146_v61, %v98_v13  ;;  %v143_v63 = vpop.xlane.xlu1 %142  ;;  %v140_v19 = vpop.xlane.xlu0 %139 }
  0xc0   :  { %v1479_v57 = vadd.f32 %v143_v63, %v95_v4  ;;  %v1482_v27 = vadd.f32 %v140_v19, %v1424_v9  ;;  %v760_v9 = vpop.f32.mrf.mxu1  ;;  %v650_v13 = vpop.f32.mrf.mxu0  ;;  %v1542_v63 = vadd.f32 %v757_v42, %v644_v48  ;;  %v1555_v48 = vmul.f32 %v317_v22, %v317_v22 }
  0xc1   :  { %v1544_v19 = vadd.f32 %v760_v9, %v647_v17  ;;  %v318_v17 = vmul.f32 0.03125, %v1468_v47  ;;  %v1561_v9 = vmul.f32 %v1517_v23, %v317_v22  ;;  %v1576_v22 = vmul.f32 %v1517_v23, %v319_v41 }
  0xc3   :  { %v1579_v1 = vmul.f32 %v1517_v23, %v318_v17 }
  0xc6   :  { %v1484_v3 = vpop.xlane.xlu2 %186 }
  0xc7   :  { %v152_v6 = vpop.xlane.xlu1 %151  ;;  %v149_v7 = vpop.xlane.xlu0 %148 }
  0xc8   :  { %v1486_v8 = vadd.f32 %v152_v6, %v104_v2  ;;  %v1488_v0 = vadd.f32 %v149_v7, %v101_v25  ;;  %v763_v26 = vpop.f32.mrf.mxu1  ;;  %v653_v11 = vpop.f32.mrf.mxu0  ;;  %v345_v6 = vmul.f32 %v313_v43, %v313_v43  ;;  %v320_v43 = vmul.f32 0.03125, %v1463_v28 }
  0xc9   :  { %v1550_v55 = vadd.f32 %v763_v26, %v650_v13  ;;  %v671_v7 = vpop.f32.mrf.mxu2  ;;  %v1564_v13 = vmul.f32 %v1517_v23, %v316_v33  ;;  %v1567_v26 = vmul.f32 %v1517_v23, %v315_v30 }
  0xca   :  { %v1557_v42 = vadd.f32 %v784_v18, %v671_v7  ;;  %v347_v18 = vmul.f32 %v315_v30, %v315_v30  ;;  %v1592_v30 = vmul.f32 %v1517_v23, %v320_v43 }
  0xcc   :  { %1957 = vst [vmem:[#allocation8_spill] sm:$0xff] %v1557_v42 }
  0xce   :  { %v1490_v34 = vpop.xlane.xlu2 %195 }
  0xcf   :  { %v193_v16 = vpop.xlane.xlu1 %192  ;;  %v190_v5 = vpop.xlane.xlu0 %189 }
  0xd0   :  { %v766_v2 = vpop.f32.mrf.mxu1  ;;  %v656_v61 = vpop.f32.mrf.mxu0 }
  0xd1   :  { %v1573_v45 = vadd.f32 %v766_v2, %v653_v11  ;;  %v1589_v2 = vmul.f32 %v320_v43, %v320_v43 }
  0xd6   :  { %v1492_v12 = vpop.xlane.xlu2 %204 }
  0xd7   :  { %v1494_v54 = vpop.xlane.xlu1 %201  ;;  %v1496_v53 = vpop.xlane.xlu0 %198 }
  0xd8   :  { %v769_v52 = vpop.f32.mrf.mxu1 }
  0xd9   :  { %v1581_v36 = vadd.f32 %v769_v52, %v656_v61  ;;  %v1594_v52 = vmul.f32 %v319_v41, %v319_v41 }
  0xde   :  { %v1498_v4 = vpop.xlane.xlu2 %213 }
  0xdf   :  { %v1500_v25 = vpop.xlane.xlu1 %210  ;;  %v1502_v14 = vpop.xlane.xlu0 %207 }
  0xe6   :  { %v1508_v29 = vpop.xlane.xlu2 %222 }
  0xe7   :  { %v1510_v20 = vpop.xlane.xlu1 %219  ;;  %v1512_v32 = vpop.xlane.xlu0 %216 }
  0xee   :  { %v1521_v15 = vpop.xlane.xlu2 %231 }
  0xef   :  { %v1523_v21 = vpop.xlane.xlu1 %228  ;;  %v1525_v46 = vpop.xlane.xlu0 %225 }
  0xf6   :  { %v257_v24 = vpop.xlane.xlu2 %256 }
  0xf7   :  { %v254_v51 = vpop.xlane.xlu1 %253  ;;  %v299_v39 = vadd.f32 %v257_v24, %v193_v16  ;;  %v251_v40 = vpop.xlane.xlu0 %250 }
  0xf8   :  { %v298_v7 = vadd.f32 %v254_v51, %v190_v5  ;;  %v297_v47 = vadd.f32 %v251_v40, %v1484_v3  ;;  %v350_v51 = vmul.f32 %v318_v17, %v318_v17  ;;  %v659_v40 = vpop.f32.mrf.mxu0 }
  0xf9   :  { %v331_v44 = vmul.f32 0.03125, %v299_v39  ;;  %v321_v39 = vmul.f32 0.03125, %v1475_v60 }
  0xfa   :  { %v330_v16 = vmul.f32 0.03125, %v298_v7  ;;  %v329_v33 = vmul.f32 0.03125, %v297_v47 }
  0xfb   :  { %v363_v11 = vsub.f32 %v331_v44, %v347_v18  ;;  %v772_v18 = vpop.f32.mrf.mxu1 }
  0xfc   :  { %v362_v24 = vsub.f32 %v330_v16, %v346_v10  ;;  %v361_v61 = vsub.f32 %v329_v33, %v345_v6  ;;  %v323_v10 = vmul.f32 0.03125, %v1470_v35  ;;  %v1603_v6 = vmul.f32 0.03125, %v1472_v58 }
  0xfd   :  { %v379_v7 = vmax.f32 %v363_v11, 0.0  ;;  %v324_v35 = vmul.f32 0.03125, %v1482_v27 }
  0xfe   :  { %v378_v3 = vmax.f32 %v362_v24, 0.0  ;;  %v377_v28 = vmax.f32 %v361_v61, 0.0  ;;  %v266_v43 = vpop.xlane.xlu2 %265  ;;  %1958 = vst [vmem:[#allocation9_spill] sm:$0xff] %v1603_v6  ;;  %v1615_v61 = vmul.f32 %v1517_v23, %v321_v39  ;;  %v1632_v27 = vmul.f32 %v1517_v23, %v323_v10 }
  0xff   :  { %v1605_v41 = vadd.f32 1e-05, %v379_v7  ;;  %v263_v60 = vpop.xlane.xlu1 %262  ;;  %v302_v17 = vadd.f32 %v266_v43, %v1494_v54  ;;  %v260_v16 = vpop.xlane.xlu0 %259  ;;  %v1619_v7 = vadd.f32 %v772_v18, %v659_v40  ;;  %v1622_v54 = vmul.f32 0.03125, %v1477_v62 }
 0x100   :  { %v1608_v33 = vadd.f32 1e-05, %v378_v3  ;;  %v1610_v11 = vadd.f32 1e-05, %v377_v28  ;;  %v301_v44 = vadd.f32 %v263_v60, %v1496_v53  ;;  %v300_v24 = vadd.f32 %v260_v16, %v1490_v34  ;;  %1961 = vst [vmem:[#allocation12_spill] sm:$0xff] %v1632_v27 }
 0x101   :  { %946 = vrsqrt.f32 %v1605_v41  ;;  %v334_v58 = vmul.f32 0.03125, %v302_v17  ;;  %1959 = vst [vmem:[#allocation10_spill] sm:$0xff] %v1622_v54  ;;  %v1626_v53 = vmul.f32 0.03125, %v1479_v57  ;;  %v1629_v43 = vmul.f32 %v323_v10, %v323_v10 }
 0x102   :  { %948 = vrsqrt.f32 %v1608_v33  ;;  %v333_v28 = vmul.f32 0.03125, %v301_v44  ;;  %v332_v3 = vmul.f32 0.03125, %v300_v24  ;;  %v1636_v40 = vmul.f32 %v1603_v6, %v1603_v6 }
 0x103   :  { %1960 = vst [vmem:[#allocation11_spill] sm:$0xff] %v1626_v53  ;;  %950 = vrsqrt.f32 %v1610_v11  ;;  %v366_v34 = vsub.f32 %v334_v58, %v350_v51  ;;  %v1639_v18 = vmul.f32 %v321_v39, %v321_v39  ;;  %v1642_v57 = vmul.f32 %v1517_v23, %v324_v35 }
 0x104   :  { %v365_v62 = vsub.f32 %v333_v28, %v1555_v48  ;;  %v364_v51 = vsub.f32 %v332_v3, %v1569_v49  ;;  %v1651_v17 = vmul.f32 %v1622_v54, %v1622_v54  ;;  %v1657_v24 = vmul.f32 %v1626_v53, %v1626_v53 }
 0x105   :  { %1962 = vst [vmem:[#allocation13_spill] sm:$0xff] %v1642_v57  ;;  %v382_v44 = vmax.f32 %v366_v34, 0.0  ;;  %v1659_v58 = vmul.f32 %v324_v35, %v324_v35  ;;  %vm435_vm1 = vweird.f32 %v1605_v41  ;;  %vm425_vm2 = vweird.f32 %v1608_v33 }
 0x106   :  { %v381_v16 = vmax.f32 %v365_v62, 0.0  ;;  %v275_v48 = vpop.xlane.xlu2 %274  ;;  %v380_v28 = vmax.f32 %v364_v51, 0.0  ;;  %vm415_vm3 = vweird.f32 %v1610_v11 }
 0x107   :  { %v1653_v39 = vpop.eup %946  ;;  %v1661_v49 = vadd.f32 1e-05, %v382_v44  ;;  %v272_v34 = vpop.xlane.xlu1 %271  ;;  %v305_v5 = vadd.f32 %v275_v48, %v1500_v25  ;;  %v1676_v44 = vmul.f32 0.03125, %v1486_v8 }
 0x108   :  { %v269_v3 = vpop.xlane.xlu0 %268  ;;  %v1663_v60 = vpop.eup %948  ;;  %v430_v10 = vmul.f32 %v1653_v39, %v1605_v41  ;;  %v1667_v62 = vadd.f32 1e-05, %v381_v16  ;;  %v304_v47 = vadd.f32 %v272_v34, %v1502_v14  ;;  %v1688_v8 = vadd.f32 1e-05, %v380_v28 }
 0x109   :  { %v1671_v53 = vpop.eup %950  ;;  %v420_v51 = vmul.f32 %v1663_v60, %v1608_v33  ;;  %952 = vrsqrt.f32 %v1661_v49  ;;  %v337_v54 = vmul.f32 0.03125, %v305_v5  ;;  %vm436_vm4 = vweird.f32 %v1653_v39 }
 0x10a   :  { %v431_v16 = vmul.f32 %v1653_v39, %v430_v10  ;;  %v410_v25 = vmul.f32 %v1671_v53, %v1610_v11  ;;  %954 = vrsqrt.f32 %v1667_v62  ;;  %v336_v48 = vmul.f32 0.03125, %v304_v47  ;;  %vm437_vm8 = vmor %vm435_vm1, %vm436_vm4 }
 0x10b   :  { %v421_v14 = vmul.f32 %v1663_v60, %v420_v51  ;;  %v303_v10 = vadd.f32 %v269_v3, %v1492_v12  ;;  %956 = vrsqrt.f32 %v1688_v8  ;;  %v369_v28 = vsub.f32 %v337_v54, %v1639_v18 }
 0x10c   :  { %v432_v34 = vmul.f32 0.5, %v431_v16  ;;  %v411_v35 = vmul.f32 %v1671_v53, %v410_v25  ;;  %v368_v6 = vsub.f32 %v336_v48, %v1589_v2  ;;  %vm426_vm5 = vweird.f32 %v1663_v60 }
 0x10d   :  { %v422_v23 = vmul.f32 0.5, %v421_v14  ;;  %vm416_vm6 = vweird.f32 %v1671_v53  ;;  %vm465_vm7 = vweird.f32 %v1661_v49  ;;  %v335_v54 = vmul.f32 0.03125, %v303_v10  ;;  %vm427_vm10 = vmor %vm425_vm2, %vm426_vm5 }
 0x10e   :  { %v433_v57 = vsub.f32 1.5, %v432_v34  ;;  %v412_v51 = vmul.f32 0.5, %v411_v35  ;;  %v284_v47 = vpop.xlane.xlu2 %283  ;;  %v384_v12 = vmax.f32 %v368_v6, 0.0  ;;  %vm455_vm9 = vweird.f32 %v1667_v62  ;;  %vm417_vm11 = vmor %vm415_vm3, %vm416_vm6 }
 0x10f   :  { %v1697_v16 = vpop.eup %952  ;;  %v423_v25 = vsub.f32 1.5, %v422_v23  ;;  %v1712_v23 = vld [vmem:[%s1945_s5] ss:$0 sm:$0xff]  ;;  %v308_v48 = vadd.f32 %v284_v47, %v1510_v20  ;;  %vm445_vm15 = vweird.f32 %v1688_v8  ;;  %s1004_s5 = smov [#allocation2]  }
 0x110   :  { %v1701_v5 = vpop.xlane.xlu0 %277  ;;  %v1703_v3 = vpop.eup %954  ;;  %v434_v2 = vmul.f32 %v1653_v39, %v433_v57  ;;  %v413_v14 = vsub.f32 1.5, %v412_v51  ;;  %v460_v35 = vmul.f32 %v1697_v16, %v1661_v49  ;;  %v1722_v57 = vadd.f32 1e-05, %v384_v12  ;;  %s891_s16 = sshll.u32 %s1004_s5, 4  ;;  %s892_s16 = int_to_ptr.vmem [resolvable:$true] %s891_s16 }
 0x111   :  { %v424_v6 = vmul.f32 %v1663_v60, %v423_v25  ;;  %v450_v18 = vmul.f32 %v1703_v3, %v1667_v62  ;;  %v385_v51 = vmax.f32 %v369_v28, 0.0  ;;  %v281_v25 = vpop.xlane.xlu1 %280  ;;  %v957_v42 = vpop.eup %956  ;;  %v1963_v12 = vsub.f32 %v1542_v63, %v1567_v26 }
 0x112   :  { %v438_v34 = vsel %vm437_vm8, %v1653_v39, %v434_v2  ;;  %v414_v10 = vmul.f32 %v1671_v53, %v413_v14  ;;  %v461_v41 = vmul.f32 %v1697_v16, %v460_v35  ;;  %958 = vrsqrt.f32 %v1722_v57 }
 0x113   :  { %v428_v27 = vsel %vm427_vm10, %v1663_v60, %v424_v6  ;;  %v837_v20 = vmul.f32 %v1963_v12, %v438_v34  ;;  %v451_v33 = vmul.f32 %v1703_v3, %v450_v18  ;;  %v1964_v39 = vsub.f32 %v1527_v38, %v1530_v50 }
 0x114   :  { %v418_v47 = vsel %vm417_vm11, %v1671_v53, %v414_v10  ;;  %v462_v60 = vmul.f32 0.5, %v461_v41  ;;  %v440_v2 = vmul.f32 %v957_v42, %v1688_v8  ;;  %v1965_v26 = vsub.f32 %v1532_v59, %v1535_v56 }
 0x115   :  { %v836_v28 = vmul.f32 %v1964_v39, %v428_v27  ;;  %v857_v63 = vadd.f32 %v1712_v23, %v837_v20  ;;  %v452_v14 = vmul.f32 0.5, %v451_v33  ;;  %vm466_vm12 = vweird.f32 %v1697_v16 }
 0x116   :  { %v835_v11 = vmul.f32 %v1965_v26, %v418_v47  ;;  %vm456_vm13 = vweird.f32 %v1703_v3  ;;  %v463_v38 = vsub.f32 1.5, %v462_v60  ;;  %v441_v50 = vmul.f32 %v957_v42, %v440_v2  ;;  %vm467_vm14 = vmor %vm465_vm7, %vm466_vm12 }
 0x117   :  { %v856_v35 = vadd.f32 %v1712_v23, %v836_v28  ;;  %873 = vst [vmem:[#allocation2 + $0x10] sm:$0xff] %v857_v63  ;;  %v453_v27 = vsub.f32 1.5, %v452_v14  ;;  %v1755_v6 = vadd.f32 1e-05, %v385_v51  ;;  %v367_v18 = vsub.f32 %v335_v54, %v1594_v52  ;;  %vm457_vm0 = vmor %vm455_vm9, %vm456_vm13 }
 0x118   :  { %v855_v53 = vadd.f32 %v1712_v23, %v835_v11  ;;  %v464_v59 = vmul.f32 %v1697_v16, %v463_v38  ;;  %v442_v56 = vmul.f32 0.5, %v441_v50  ;;  %v307_v34 = vadd.f32 %v281_v25, %v1512_v32  ;;  %v1760_v41 = vpop.eup %958  ;;  %v1769_v54 = vpop.xlane.xlu0 %286 }
 0x119   :  { %872 = vst [vmem:[#allocation2 + $0x8] sm:$0xff] %v856_v35  ;;  %v340_v10 = vmul.f32 0.03125, %v308_v48  ;;  %v454_v12 = vmul.f32 %v1703_v3, %v453_v27  ;;  %960 = vrsqrt.f32 %v1755_v6  ;;  %v383_v52 = vmax.f32 %v367_v18, 0.0  ;;  %v290_v2 = vpop.xlane.xlu1 %289  ;;  %v1806_v38 = vpop.f32.mrf.mxu2 }
 0x11a   :  { %871 = vst [vmem:[#allocation2] sm:$0xff] %v855_v53  ;;  %v468_v32 = vsel %vm467_vm14, %v1697_v16, %v464_v59  ;;  %v443_v48 = vsub.f32 1.5, %v442_v56  ;;  %vm446_vm1 = vweird.f32 %v957_v42  ;;  %v480_v49 = vmul.f32 %v1760_v41, %v1722_v57  ;;  %v293_v18 = vpop.xlane.xlu2 %292 }
 0x11b   :  { %v458_v51 = vsel %vm457_vm0, %v1703_v3, %v454_v12  ;;  %v1966_v25 = vsub.f32 %v1573_v45, %v1579_v1  ;;  %v1782_v33 = vadd.f32 1e-05, %v383_v52  ;;  %v339_v39 = vmul.f32 0.03125, %v307_v34  ;;  %vm447_vm2 = vmor %vm445_vm15, %vm446_vm1 }
 0x11c   :  { %v1967_v62 = vsub.f32 %v1550_v55, %v1561_v9  ;;  %v444_v47 = vmul.f32 %v957_v42, %v443_v48  ;;  %v481_v16 = vmul.f32 %v1760_v41, %v480_v49  ;;  %v372_v60 = vsub.f32 %v340_v10, %v1659_v58 }
 0x11d   :  { %v840_v20 = vmul.f32 %v1966_v25, %v468_v32  ;;  %v1790_v63 = vmul.f32 0.03125, %v1488_v0  ;;  %962 = vrsqrt.f32 %v1782_v33  ;;  %v371_v1 = vsub.f32 %v339_v39, %v1629_v43  ;;  %v1808_v43 = vpop.f32.mrf.mxu3 }
 0x11e   :  { %v839_v28 = vmul.f32 %v1967_v62, %v458_v51  ;;  %v448_v45 = vsel %vm447_vm2, %v957_v42, %v444_v47  ;;  %v482_v9 = vmul.f32 0.5, %v481_v16  ;;  %v388_v26 = vmax.f32 %v372_v60, 0.0 }
 0x11f   :  { %v860_v3 = vadd.f32 %v1712_v23, %v840_v20  ;;  %v1798_v11 = vpop.eup %960  ;;  %v1968_v0 = vsub.f32 %v1544_v19, %v1564_v13  ;;  %v387_v14 = vmax.f32 %v371_v1, 0.0  ;;  %v306_v8 = vadd.f32 %v1701_v5, %v1498_v4 }
 0x120   :  { %v859_v55 = vadd.f32 %v1712_v23, %v839_v28  ;;  %v310_v35 = vadd.f32 %v290_v2, %v1525_v46  ;;  %v483_v42 = vsub.f32 1.5, %v482_v9  ;;  %vm486_vm3 = vweird.f32 %v1760_v41  ;;  %v296_v10 = vpop.xlane.xlu0 %295 }
 0x121   :  { %876 = vst [vmem:[#allocation2 + $0x28] sm:$0xff] %v860_v3  ;;  %v838_v58 = vmul.f32 %v1968_v0, %v448_v45  ;;  %v490_v50 = vmul.f32 %v1798_v11, %v1755_v6  ;;  %v1813_v53 = vadd.f32 1e-05, %v388_v26  ;;  %v1816_v13 = vadd.f32 1e-05, %v387_v14 }
 0x122   :  { %875 = vst [vmem:[#allocation2 + $0x20] sm:$0xff] %v859_v55  ;;  %v338_v4 = vmul.f32 0.03125, %v306_v8  ;;  %v342_v5 = vmul.f32 0.03125, %v310_v35  ;;  %v484_v46 = vmul.f32 %v1760_v41, %v483_v42  ;;  %vm485_vm4 = vweird.f32 %v1722_v57 }
 0x123   :  { %v858_v19 = vadd.f32 %v1712_v23, %v838_v58  ;;  %v491_v27 = vmul.f32 %v1798_v11, %v490_v50  ;;  %964 = vrsqrt.f32 %v1813_v53  ;;  %v963_v59 = vpop.eup %962  ;;  %v1824_v56 = vmul.f32 %v1676_v44, %v1676_v44  ;;  %vm487_vm5 = vmor %vm485_vm4, %vm486_vm3 }
 0x124   :  { %966 = vrsqrt.f32 %v1816_v13  ;;  %v370_v34 = vsub.f32 %v338_v4, %v1636_v40  ;;  %v374_v57 = vsub.f32 %v342_v5, %v1651_v17  ;;  %v488_v12 = vsel %vm487_vm5, %v1760_v41, %v484_v46 }
 0x125   :  { %874 = vst [vmem:[#allocation2 + $0x18] sm:$0xff] %v858_v19  ;;  %v492_v52 = vmul.f32 0.5, %v491_v27  ;;  %vm496_vm6 = vweird.f32 %v1798_v11  ;;  %v470_v32 = vmul.f32 %v963_v59, %v1782_v33  ;;  %v1969_v48 = vsub.f32 %v1619_v7, %v1592_v30  ;;  %v790_v3 = vpop.f32.mrf.mxu3 }
 0x126   :  { %v386_v51 = vmax.f32 %v370_v34, 0.0  ;;  %v390_v25 = vmax.f32 %v374_v57, 0.0  ;;  %v311_v20 = vadd.f32 %v293_v18, %v1523_v21  ;;  %v309_v17 = vadd.f32 %v1769_v54, %v1508_v29  ;;  %v1859_v54 = vpop.f32.mrf.mxu2 }
 0x127   :  { %v842_v49 = vmul.f32 %v1969_v48, %v488_v12  ;;  %v493_v39 = vsub.f32 1.5, %v492_v52  ;;  %v471_v40 = vmul.f32 %v963_v59, %v470_v32  ;;  %v312_v41 = vadd.f32 %v296_v10, %v1521_v15  ;;  %v1972_v48 = vld [vmem:[#allocation5_spill] sm:$0xff] }
 0x128   :  { %vm495_vm7 = vweird.f32 %v1755_v6  ;;  %v1843_v28 = vadd.f32 1e-05, %v386_v51  ;;  %v1845_v47 = vadd.f32 1e-05, %v390_v25  ;;  %v343_v16 = vmul.f32 0.03125, %v311_v20  ;;  %v1973_v51 = vld [vmem:[#allocation12_spill] sm:$0xff] }
 0x129   :  { %v862_v62 = vadd.f32 %v1712_v23, %v842_v49  ;;  %v1847_v30 = vpop.eup %964  ;;  %v494_v7 = vmul.f32 %v1798_v11, %v493_v39  ;;  %v472_v21 = vmul.f32 0.5, %v471_v40  ;;  %v341_v60 = vmul.f32 0.03125, %v309_v17  ;;  %vm497_vm8 = vmor %vm495_vm7, %vm496_vm6  ;;  %v1974_v25 = vld [vmem:[#allocation7_spill] sm:$0xff]  ;;  %v1975_v17 = vld [vmem:[#allocation8_spill] sm:$0xff] }
 0x12a   :  { %v1850_v2 = vpop.eup %966  ;;  %v359_v29 = vmul.f32 %v1790_v63, %v1790_v63  ;;  %v520_v15 = vmul.f32 %v1847_v30, %v1813_v53  ;;  %968 = vrsqrt.f32 %v1843_v28  ;;  %v344_v6 = vmul.f32 0.03125, %v312_v41  ;;  %v1976_v41 = vld [vmem:[#allocation13_spill] sm:$0xff] }
 0x12b   :  { %878 = vst [vmem:[#allocation2 + $0x38] sm:$0xff] %v862_v62  ;;  %v498_v1 = vsel %vm497_vm8, %v1798_v11, %v494_v7  ;;  %v473_v55 = vsub.f32 1.5, %v472_v21  ;;  %vm476_vm9 = vweird.f32 %v963_v59  ;;  %v510_v45 = vmul.f32 %v1850_v2, %v1816_v13 }
 0x12c   :  { %v1970_v9 = vsub.f32 %v1538_v37, %v1615_v61  ;;  %vm475_vm10 = vweird.f32 %v1782_v33  ;;  %v521_v0 = vmul.f32 %v1847_v30, %v520_v15  ;;  %970 = vrsqrt.f32 %v1845_v47 }
 0x12d   :  { %v474_v58 = vmul.f32 %v963_v59, %v473_v55  ;;  %v511_v14 = vmul.f32 %v1850_v2, %v510_v45  ;;  %v375_v8 = vsub.f32 %v343_v16, %v359_v29  ;;  %v373_v11 = vsub.f32 %v341_v60, %v1657_v24  ;;  %vm477_vm11 = vmor %vm475_vm10, %vm476_vm9  ;;  %v793_v39 = vpop.f32.mrf.mxu3  ;;  %v1978_v16 = vld [vmem:[#allocation9_spill] sm:$0xff]  ;;  %v1979_v60 = vld [vmem:[#allocation6_spill] sm:$0xff] }
 0x12e   :  { %v843_v26 = vmul.f32 %v1970_v9, %v498_v1  ;;  %v522_v42 = vmul.f32 0.5, %v521_v0  ;;  %vm525_vm12 = vweird.f32 %v1813_v53  ;;  %v376_v37 = vsub.f32 %v344_v6, %v1824_v56  ;;  %v680_v53 = vpop.f32.mrf.mxu2  ;;  %v1980_v55 = vld [vmem:[#allocation10_spill] sm:$0xff] }
 0x12f   :  { %v478_v61 = vsel %vm477_vm11, %v963_v59, %v474_v58  ;;  %v512_v33 = vmul.f32 0.5, %v511_v14  ;;  %v391_v50 = vmax.f32 %v375_v8, 0.0  ;;  %v389_v19 = vmax.f32 %v373_v11, 0.0 }
 0x130   :  { %v863_v35 = vadd.f32 %v1712_v23, %v843_v26  ;;  %v969_v4 = vpop.eup %968  ;;  %v1971_v5 = vsub.f32 %v1581_v36, %v1576_v22  ;;  %v523_v27 = vsub.f32 1.5, %v522_v42  ;;  %vm526_vm13 = vweird.f32 %v1847_v30 }
 0x131   :  { %v392_v24 = vmax.f32 %v376_v37, 0.0  ;;  %v513_v18 = vsub.f32 1.5, %v512_v33  ;;  %vm516_vm14 = vweird.f32 %v1850_v2  ;;  %v500_v34 = vmul.f32 %v969_v4, %v1843_v28  ;;  %vm527_vm0 = vmor %vm525_vm12, %vm526_vm13 }
 0x132   :  { %879 = vst [vmem:[#allocation2 + $0x40] sm:$0xff] %v863_v35  ;;  %v841_v46 = vmul.f32 %v1971_v5, %v478_v61  ;;  %v1881_v56 = vadd.f32 1e-05, %v391_v50  ;;  %v971_v59 = vpop.eup %970  ;;  %vm515_vm15 = vweird.f32 %v1816_v13  ;;  %v524_v10 = vmul.f32 %v1847_v30, %v523_v27 }
 0x133   :  { %v1886_v36 = vadd.f32 1e-05, %v389_v19  ;;  %v514_v22 = vmul.f32 %v1850_v2, %v513_v18  ;;  %v501_v12 = vmul.f32 %v969_v4, %v500_v34  ;;  %v540_v52 = vmul.f32 %v971_v59, %v1845_v47  ;;  %vm517_vm1 = vmor %vm515_vm15, %vm516_vm14 }
 0x134   :  { %v861_v57 = vadd.f32 %v1712_v23, %v841_v46  ;;  %v1892_v32 = vadd.f32 1e-05, %v392_v24  ;;  %v779_v49 = vadd.f32 %v1972_v48, %v1504_v31  ;;  %v829_v13 = vsub.f32 %v1974_v25, %v1973_v51 }
 0x135   :  { %v528_v20 = vsel %vm527_vm0, %v1847_v30, %v524_v10  ;;  %972 = vrsqrt.f32 %v1881_v56  ;;  %v518_v40 = vsel %vm517_vm1, %v1850_v2, %v514_v22  ;;  %v1977_v62 = vsub.f32 %v1975_v17, %v1976_v41  ;;  %v796_v46 = vpop.f32.mrf.mxu3 }
 0x136   :  { %877 = vst [vmem:[#allocation2 + $0x30] sm:$0xff] %v861_v57  ;;  %v502_v31 = vmul.f32 0.5, %v501_v12  ;;  %v541_v21 = vmul.f32 %v971_v59, %v540_v52  ;;  %v812_v29 = vmul.f32 %v1979_v60, %v1978_v16  ;;  %v845_v15 = vmul.f32 %v829_v13, %v518_v40  ;;  %v1981_v12 = vld [vmem:[#allocation11_spill] sm:$0xff] }
 0x137   :  { %v846_v7 = vmul.f32 %v1977_v62, %v528_v20  ;;  %vm506_vm2 = vweird.f32 %v969_v4  ;;  %974 = vrsqrt.f32 %v1886_v36  ;;  %v791_v2 = vadd.f32 %v790_v3, %v1859_v54 }
 0x138   :  { %v503_v6 = vsub.f32 1.5, %v502_v31  ;;  %v542_v1 = vmul.f32 0.5, %v541_v21  ;;  %976 = vrsqrt.f32 %v1892_v32  ;;  %v816_v45 = vmul.f32 %v1979_v60, %v1980_v55 }
 0x139   :  { %v866_v30 = vadd.f32 %v1712_v23, %v846_v7  ;;  %v865_v9 = vadd.f32 %v1712_v23, %v845_v15  ;;  %vm505_vm3 = vweird.f32 %v1843_v28  ;;  %vm546_vm4 = vweird.f32 %v971_v59 }
 0x13a   :  { %v504_v26 = vmul.f32 %v969_v4, %v503_v6  ;;  %v543_v0 = vsub.f32 1.5, %v542_v1  ;;  %v828_v14 = vsub.f32 %v779_v49, %v812_v29  ;;  %vm507_vm5 = vmor %vm505_vm3, %vm506_vm2  ;;  %vm545_vm6 = vweird.f32 %v1845_v47 }
 0x13b   :  { %882 = vst [vmem:[#allocation2 + $0x58] sm:$0xff] %v866_v30  ;;  %v973_v58 = vpop.eup %972  ;;  %v832_v35 = vsub.f32 %v791_v2, %v816_v45  ;;  %vm547_vm7 = vmor %vm545_vm6, %vm546_vm4  ;;  %v794_v24 = vadd.f32 %v793_v39, %v680_v53  ;;  %v817_v18 = vmul.f32 %v1979_v60, %v1790_v63  ;;  %v788_v57 = vadd.f32 %v1808_v43, %v1806_v38 }
 0x13c   :  { %881 = vst [vmem:[#allocation2 + $0x50] sm:$0xff] %v865_v9  ;;  %v508_v8 = vsel %vm507_vm5, %v969_v4, %v504_v26  ;;  %v544_v11 = vmul.f32 %v971_v59, %v543_v0  ;;  %v550_v54 = vmul.f32 %v973_v58, %v1881_v56  ;;  %v683_v4 = vpop.f32.mrf.mxu2  ;;  %vm556_vm8 = vweird.f32 %v973_v58 }
 0x13d   :  { %v975_v3 = vpop.eup %974  ;;  %v844_v42 = vmul.f32 %v828_v14, %v508_v8  ;;  %v815_v52 = vmul.f32 %v1979_v60, %v1981_v12  ;;  %v818_v48 = vmul.f32 %v1979_v60, %v1676_v44  ;;  %v797_v49 = vadd.f32 %v796_v46, %v683_v4 }
 0x13e   :  { %v977_v37 = vpop.eup %976  ;;  %v548_v61 = vsel %vm547_vm7, %v971_v59, %v544_v11  ;;  %v551_v28 = vmul.f32 %v973_v58, %v550_v54  ;;  %v530_v33 = vmul.f32 %v975_v3, %v1886_v36  ;;  %vm555_vm9 = vweird.f32 %v1881_v56 }
 0x13f   :  { %v864_v50 = vadd.f32 %v1712_v23, %v844_v42  ;;  %v848_v19 = vmul.f32 %v832_v35, %v548_v61  ;;  %v560_v5 = vmul.f32 %v977_v37, %v1892_v32  ;;  %vm536_vm10 = vweird.f32 %v975_v3  ;;  %vm557_vm11 = vmor %vm555_vm9, %vm556_vm8 }
 0x140   :  { %v552_v27 = vmul.f32 0.5, %v551_v28  ;;  %v531_v47 = vmul.f32 %v975_v3, %v530_v33  ;;  %v833_v13 = vsub.f32 %v794_v24, %v817_v18  ;;  %vm566_vm12 = vweird.f32 %v977_v37 }
 0x141   :  { %880 = vst [vmem:[#allocation2 + $0x48] sm:$0xff] %v864_v50  ;;  %v868_v34 = vadd.f32 %v1712_v23, %v848_v19  ;;  %v561_v59 = vmul.f32 %v977_v37, %v560_v5  ;;  %vm535_vm13 = vweird.f32 %v1886_v36  ;;  %v831_v53 = vsub.f32 %v788_v57, %v815_v52 }
 0x142   :  { %v553_v10 = vsub.f32 1.5, %v552_v27  ;;  %v532_v22 = vmul.f32 0.5, %v531_v47  ;;  %vm537_vm14 = vmor %vm535_vm13, %vm536_vm10  ;;  %vm565_vm15 = vweird.f32 %v1892_v32  ;;  %v834_v40 = vsub.f32 %v797_v49, %v818_v48 }
 0x143   :  { %884 = vst [vmem:[#allocation2 + $0x68] sm:$0xff] %v868_v34  ;;  %v562_v51 = vmul.f32 0.5, %v561_v59  ;;  %vm567_vm0 = vmor %vm565_vm15, %vm566_vm12 }
 0x144   :  { %v554_v63 = vmul.f32 %v973_v58, %v553_v10  ;;  %v533_v25 = vsub.f32 1.5, %v532_v22 }
 0x145   :  { %v563_v38 = vsub.f32 1.5, %v562_v51 }
 0x146   :  { %v558_v43 = vsel %vm557_vm11, %v973_v58, %v554_v63  ;;  %v534_v20 = vmul.f32 %v975_v3, %v533_v25 }
 0x147   :  { %v849_v39 = vmul.f32 %v833_v13, %v558_v43  ;;  %v564_v44 = vmul.f32 %v977_v37, %v563_v38 }
 0x148   :  { %v538_v17 = vsel %vm537_vm14, %v975_v3, %v534_v20 }
 0x149   :  { %v869_v56 = vadd.f32 %v1712_v23, %v849_v39  ;;  %v847_v41 = vmul.f32 %v831_v53, %v538_v17  ;;  %v568_v62 = vsel %vm567_vm0, %v977_v37, %v564_v44 }
 0x14a   :  { %v850_v36 = vmul.f32 %v834_v40, %v568_v62 }
 0x14b   :  { %885 = vst [vmem:[#allocation2 + $0x70] sm:$0xff] %v869_v56  ;;  %v867_v7 = vadd.f32 %v1712_v23, %v847_v41 }
 0x14c   :  { %v870_v32 = vadd.f32 %v1712_v23, %v850_v36 }
 0x14d   :  { %883 = vst [vmem:[#allocation2 + $0x60] sm:$0xff] %v867_v7 }
 0x14e   :  { %886 = vst [vmem:[#allocation2 + $0x78] sm:$0xff] %v870_v32 }
 0x14f   :  { %899 = dma.vmem_to_hbm [thread:$0]  %s892_s16, 2048, %s894_s19, [#allocation3], %s1005_s20, %s1005_s20, %s1006_s21  }
 0x150   :  { %1002 = dma.done.wait [#allocation3], 2048  }
 0x151   :  { %1003 = vsyncadd [#allocation3], 4294965248 }
 0x152   :  { %904 = vsyncpa [#allocation3], 1 }

</bundles_post_ra>
